<compile_context>
chip_gen: v5e
topology: v5e:2x2
jax: 0.10.0
libtpu: 0.0.40
codegen_flags: <defaults>
</compile_context>

<pallas_src>
import jax
import jax.numpy as jnp
from jax.experimental import pallas as pl
from jax.experimental.pallas import tpu as pltpu

GAMMA = 0.5             # module default gamma
W0, W1 = 0.1, 0.8       # CrossEntropyLoss class weights
_LANE = 128
_MAX_TILE_SAMPLES = 65536   # samples per grid step (512 rows of 128 lanes)


def _cdiv(a, b):
    return -(-a // b)


def _round_up(x, m):
    return ((x + m - 1) // m) * m


def _wce_kernel(logits_ref, labels_ref, num_ref, den_ref):
    """Accumulate per-core partial sum(w_i*nll_i) / sum(w_i) over row-blocks.

    logits_ref : (2, Rb, 128)  class-major logit planes (native dtype)
    labels_ref : (Rb, 128)     int32 labels (-1 on padding)
    num_ref    : (1, 8, 128)   resident per-core partial sum(w_i * nll_i)
    den_ref    : (1, 8, 128)   resident per-core partial sum(w_i)
    """
    s = pl.program_id(1)

    @pl.when(s == 0)
    def _init():
        num_ref[...] = jnp.zeros_like(num_ref)
        den_ref[...] = jnp.zeros_like(den_ref)

    l0 = logits_ref[0].astype(jnp.float32)        # (Rb, 128) class-0 logit
    l1 = logits_ref[1].astype(jnp.float32)        # (Rb, 128) class-1 logit
    lbl = labels_ref[...]                         # (Rb, 128) int32

    is_one = lbl == 1
    is_zero = lbl == 0

    # -log p[label] for the binary case = softplus(other_logit - label_logit),
    # stable form: max(m, 0) + log(1 + exp(-|m|)).
    margin = jnp.where(is_one, l0 - l1, l1 - l0)
    nll = jnp.maximum(margin, 0.0) + jnp.log(1.0 + jnp.exp(-jnp.abs(margin)))

    # per-sample class weight; padded / out-of-range labels get weight 0
    # (also reproduces torch's exclusion from both numerator and denominator).
    wi = jnp.where(is_one, jnp.float32(W1),
                   jnp.where(is_zero, jnp.float32(W0), jnp.float32(0.0)))

    rb = lbl.shape[0]
    # Layout-preserving regroup (Rb,128) -> (Rb/8, 8, 128); sum over the
    # leading axis is pure VALU adds (no XLU reduction inside the grid loop).
    wnll = (wi * nll).reshape(rb // 8, 8, _LANE)
    wsum = wi.reshape(rb // 8, 8, _LANE)

    num_ref[...] += jnp.sum(wnll, axis=0, keepdims=True)
    den_ref[...] += jnp.sum(wsum, axis=0, keepdims=True)


def transfer_mean_loss(prob, labels, match_loss, gamma=GAMMA,
                       max_tile_samples=_MAX_TILE_SAMPLES):
    """prob: (N, 2) float logits; labels: (N,) int; match_loss: scalar."""
    N, C = prob.shape
    assert C == 2, "TransferMeanLoss uses a 2-class weighted CrossEntropyLoss"

    rows_needed = _cdiv(N, _LANE)                       # rows of 128 samples
    max_rb = max(8, (max_tile_samples // _LANE) // 8 * 8)
    rb = min(max_rb, max(8, _round_up(_cdiv(rows_needed, 2), 8)))
    s_steps = _cdiv(rows_needed, 2 * rb)                # inner steps per core
    r_total = 2 * s_steps * rb
    n_pad = r_total * _LANE

    # Class-major, fully dense planes: one fused XLA pad+transpose+reshape pass
    # (native dtype — no wrapper f32 upcast).
    planes = jnp.pad(prob, ((0, n_pad - N), (0, 0))).T.reshape(2, r_total, _LANE)
    lbl = jnp.pad(labels.astype(jnp.int32), (0, n_pad - N),
                  constant_values=-1).reshape(r_total, _LANE)

    cost = pl.CostEstimate(
        flops=12 * n_pad,
        transcendentals=2 * n_pad,
        bytes_accessed=n_pad * (2 * prob.dtype.itemsize + 4) + 2 * 2 * 8 * _LANE * 4,
    )

    num_out, den_out = pl.pallas_call(
        _wce_kernel,
        out_shape=(
            jax.ShapeDtypeStruct((2, 8, _LANE), jnp.float32),
            jax.ShapeDtypeStruct((2, 8, _LANE), jnp.float32),
        ),
        grid_spec=pltpu.PrefetchScalarGridSpec(
            num_scalar_prefetch=0,
            grid=(2, s_steps),
            in_specs=[
                pl.BlockSpec((2, rb, _LANE), lambda c, s: (0, c * s_steps + s, 0)),
                pl.BlockSpec((rb, _LANE), lambda c, s: (c * s_steps + s, 0)),
            ],
            out_specs=[
                pl.BlockSpec((1, 8, _LANE), lambda c, s: (c, 0, 0)),
                pl.BlockSpec((1, 8, _LANE), lambda c, s: (c, 0, 0)),
            ],
        ),
        compiler_params=pltpu.CompilerParams(
            dimension_semantics=("parallel", "arbitrary"),
            vmem_limit_bytes=32 * 1024 * 1024,
        ),
        cost_estimate=cost,
    )(planes, lbl)

    num = jnp.sum(num_out)
    den = jnp.sum(den_out)
    # NOTE: den == 0 (no valid labels at all) yields inf/nan — matches torch 0/0.
    cls_loss = num / den
    return cls_loss + jnp.float32(gamma) * jnp.asarray(match_loss, jnp.float32)


def _reference(prob, labels, match_loss):
    """Pure-JAX reference mirroring torch weighted CrossEntropyLoss."""
    logp = jax.nn.log_softmax(prob.astype(jnp.float32), axis=-1)
    w = jnp.asarray([W0, W1], dtype=jnp.float32)
    lbl = labels.astype(jnp.int32)
    nll = -jnp.take_along_axis(logp, lbl[:, None], axis=-1)[:, 0]
    wi = w[lbl]
    cls = jnp.sum(wi * nll) / jnp.sum(wi)
    return cls + GAMMA * match_loss


if __name__ == "__main__":
    key = jax.random.PRNGKey(0)
    keys = jax.random.split(key, 8)

    # TODO(synk): match_loss is module state set externally via
    # match_representation() (host-side coral-loss centroid matching over
    # numpy rep lists); it is treated here as a precomputed scalar input.
    match_loss = jnp.float32(0.25)

    cases = [
        (4096, _MAX_TILE_SAMPLES, keys[0], keys[1]),  # one block per core
        (4096, 1024, keys[2], keys[3]),               # multi-step accumulation per core
        (300, _MAX_TILE_SAMPLES, keys[4], keys[5]),   # core 1 sees only padding
        (10, _MAX_TILE_SAMPLES, keys[6], keys[7]),    # ragged tail inside one row
    ]
    for n, tile, ka, kb in cases:
        prob = jax.random.normal(ka, (n, 2), dtype=jnp.float32)
        labels = jax.random.randint(kb, (n,), 0, 2, dtype=jnp.int32)

        out = transfer_mean_loss(prob, labels, match_loss, max_tile_samples=tile)
        jax.block_until_ready(out)

        ref = _reference(prob, labels, match_loss)
        assert jnp.allclose(out, ref, rtol=1e-5, atol=1e-5), (n, tile, out, ref)

    print("KERNEL_OK")
</pallas_src>

<mosaic_0001>
module attributes {stable_mosaic.version = 11 : i64} {
  func.func @_wce_kernel(%arg0: i32, %arg1: i32, %arg2: memref<2x16x128xf32, #tpu.memory_space<vmem>>, %arg3: memref<16x128xi32, #tpu.memory_space<vmem>>, %arg4: memref<1x8x128xf32, #tpu.memory_space<vmem>>, %arg5: memref<1x8x128xf32, #tpu.memory_space<vmem>>) attributes {dimension_semantics = [#tpu.dimension_semantics<parallel>, #tpu.dimension_semantics<arbitrary>], iteration_bounds = array<i64: 2, 1>, scalar_prefetch = 0 : i64, scratch_operands = 0 : i64, tpu.core_type = #tpu.core_type<tc>, window_params = [{transform_indices = @transform_0, window_bounds = array<i64: 2, 16, 128>}, {transform_indices = @transform_1, window_bounds = array<i64: 16, 128>}, {transform_indices = @transform_2, window_bounds = array<i64: 1, 8, 128>}, {transform_indices = @transform_3, window_bounds = array<i64: 1, 8, 128>}]} {
    %c0_i32 = arith.constant 0 : i32
    %0 = arith.cmpi eq, %arg1, %c0_i32 : i32
    %1 = arith.extui %0 : i1 to i32
    %c0_i32_0 = arith.constant 0 : i32
    %2 = arith.cmpi ne, %1, %c0_i32_0 : i32
    scf.if %2 {
      %cst_27 = arith.constant 0.000000e+00 : f32
      %43 = vector.broadcast %cst_27 : f32 to vector<1x8x128xf32>
      %c0_28 = arith.constant 0 : index
      %c0_29 = arith.constant 0 : index
      %c0_30 = arith.constant 0 : index
      %44 = vector.load %arg4[%c0_28, %c0_29, %c0_30] : memref<1x8x128xf32, #tpu.memory_space<vmem>>, vector<1x8x128xf32>
      tpu.vector_store %arg4[%c0_28, %c0_29, %c0_30], %43 {strides = array<i32>} : memref<1x8x128xf32, #tpu.memory_space<vmem>>, vector<1x8x128xf32>,
      %cst_31 = arith.constant 0.000000e+00 : f32
      %45 = vector.broadcast %cst_31 : f32 to vector<1x8x128xf32>
      %c0_32 = arith.constant 0 : index
      %c0_33 = arith.constant 0 : index
      %c0_34 = arith.constant 0 : index
      %46 = vector.load %arg5[%c0_32, %c0_33, %c0_34] : memref<1x8x128xf32, #tpu.memory_space<vmem>>, vector<1x8x128xf32>
      tpu.vector_store %arg5[%c0_32, %c0_33, %c0_34], %45 {strides = array<i32>} : memref<1x8x128xf32, #tpu.memory_space<vmem>>, vector<1x8x128xf32>,
    } else {
    }
    %c0 = arith.constant 0 : index
    %c0_1 = arith.constant 0 : index
    %c0_2 = arith.constant 0 : index
    %3 = vector.load %arg2[%c0, %c0_1, %c0_2] : memref<2x16x128xf32, #tpu.memory_space<vmem>>, vector<1x16x128xf32>
    %4 = vector.shape_cast %3 : vector<1x16x128xf32> to vector<16x128xf32>
    %c1 = arith.constant 1 : index
    %c0_3 = arith.constant 0 : index
    %c0_4 = arith.constant 0 : index
    %5 = vector.load %arg2[%c1, %c0_3, %c0_4] : memref<2x16x128xf32, #tpu.memory_space<vmem>>, vector<1x16x128xf32>
    %6 = vector.shape_cast %5 : vector<1x16x128xf32> to vector<16x128xf32>
    %c0_5 = arith.constant 0 : index
    %c0_6 = arith.constant 0 : index
    %7 = vector.load %arg3[%c0_5, %c0_6] : memref<16x128xi32, #tpu.memory_space<vmem>>, vector<16x128xi32>
    %c1_i32 = arith.constant 1 : i32
    %8 = vector.broadcast %c1_i32 : i32 to vector<16x128xi32>
    %9 = arith.cmpi eq, %7, %8 : vector<16x128xi32>
    %c0_i32_7 = arith.constant 0 : i32
    %10 = vector.broadcast %c0_i32_7 : i32 to vector<16x128xi32>
    %11 = arith.cmpi eq, %7, %10 : vector<16x128xi32>
    %12 = arith.subf %4, %6 : vector<16x128xf32>
    %13 = arith.subf %6, %4 : vector<16x128xf32>
    %14 = arith.select %9, %12, %13 : vector<16x128xi1>, vector<16x128xf32>
    %cst = arith.constant 0.000000e+00 : f32
    %15 = vector.broadcast %cst : f32 to vector<16x128xf32>
    %16 = arith.maximumf %14, %15 : vector<16x128xf32>
    %17 = math.absf %14 : vector<16x128xf32>
    %cst_8 = arith.constant 0.000000e+00 : f32
    %18 = vector.broadcast %cst_8 : f32 to vector<16x128xf32>
    %19 = arith.subf %18, %17 : vector<16x128xf32>
    %20 = math.exp %19 : vector<16x128xf32>
    %cst_9 = arith.constant 1.000000e+00 : f32
    %21 = vector.broadcast %cst_9 : f32 to vector<16x128xf32>
    %22 = arith.addf %21, %20 : vector<16x128xf32>
    %23 = math.log %22 : vector<16x128xf32>
    %24 = arith.addf %16, %23 : vector<16x128xf32>
    %cst_10 = arith.constant 1.000000e-01 : f32
    %cst_11 = arith.constant 0.000000e+00 : f32
    %25 = vector.broadcast %cst_10 : f32 to vector<16x128xf32>
    %26 = vector.broadcast %cst_11 : f32 to vector<16x128xf32>
    %27 = arith.select %11, %25, %26 : vector<16x128xi1>, vector<16x128xf32>
    %cst_12 = arith.constant 8.000000e-01 : f32
    %28 = vector.broadcast %cst_12 : f32 to vector<16x128xf32>
    %29 = arith.select %9, %28, %27 : vector<16x128xi1>, vector<16x128xf32>
    %30 = arith.mulf %29, %24 : vector<16x128xf32>
    %31 = vector.shape_cast %30 : vector<16x128xf32> to vector<2x8x128xf32>
    %32 = vector.shape_cast %29 : vector<16x128xf32> to vector<2x8x128xf32>
    %c0_13 = arith.constant 0 : index
    %c0_14 = arith.constant 0 : index
    %c0_15 = arith.constant 0 : index
    %33 = vector.load %arg4[%c0_13, %c0_14, %c0_15] : memref<1x8x128xf32, #tpu.memory_space<vmem>>, vector<1x8x128xf32>
    %cst_16 = arith.constant dense<0.000000e+00> : vector<8x128xf32>
    %34 = vector.multi_reduction <add>, %31, %cst_16 [0] : vector<2x8x128xf32> to vector<8x128xf32>
    %35 = vector.shape_cast %34 : vector<8x128xf32> to vector<1x8x128xf32>
    %36 = arith.addf %33, %35 : vector<1x8x128xf32>
    %c0_17 = arith.constant 0 : index
    %c0_18 = arith.constant 0 : index
    %c0_19 = arith.constant 0 : index
    %37 = vector.load %arg4[%c0_17, %c0_18, %c0_19] : memref<1x8x128xf32, #tpu.memory_space<vmem>>, vector<1x8x128xf32>
    tpu.vector_store %arg4[%c0_17, %c0_18, %c0_19], %36 {strides = array<i32>} : memref<1x8x128xf32, #tpu.memory_space<vmem>>, vector<1x8x128xf32>,
    %c0_20 = arith.constant 0 : index
    %c0_21 = arith.constant 0 : index
    %c0_22 = arith.constant 0 : index
    %38 = vector.load %arg5[%c0_20, %c0_21, %c0_22] : memref<1x8x128xf32, #tpu.memory_space<vmem>>, vector<1x8x128xf32>
    %cst_23 = arith.constant dense<0.000000e+00> : vector<8x128xf32>
    %39 = vector.multi_reduction <add>, %32, %cst_23 [0] : vector<2x8x128xf32> to vector<8x128xf32>
    %40 = vector.shape_cast %39 : vector<8x128xf32> to vector<1x8x128xf32>
    %41 = arith.addf %38, %40 : vector<1x8x128xf32>
    %c0_24 = arith.constant 0 : index
    %c0_25 = arith.constant 0 : index
    %c0_26 = arith.constant 0 : index
    %42 = vector.load %arg5[%c0_24, %c0_25, %c0_26] : memref<1x8x128xf32, #tpu.memory_space<vmem>>, vector<1x8x128xf32>
    tpu.vector_store %arg5[%c0_24, %c0_25, %c0_26], %41 {strides = array<i32>} : memref<1x8x128xf32, #tpu.memory_space<vmem>>, vector<1x8x128xf32>,
    return
  }
  func.func @transform_0(%arg0: i32, %arg1: i32) -> (i32, i32, i32) {
    %c1_i32 = arith.constant 1 : i32
    %0 = arith.muli %arg0, %c1_i32 : i32
    %1 = arith.addi %0, %arg1 : i32
    %c0_i32 = arith.constant 0 : i32
    %c0_i32_0 = arith.constant 0 : i32
    %c0_i32_1 = arith.constant 0 : i32
    return %c0_i32, %1, %c0_i32_0 : i32, i32, i32
  }
  func.func @transform_1(%arg0: i32, %arg1: i32) -> (i32, i32) {
    %c1_i32 = arith.constant 1 : i32
    %0 = arith.muli %arg0, %c1_i32 : i32
    %1 = arith.addi %0, %arg1 : i32
    %c0_i32 = arith.constant 0 : i32
    %c0_i32_0 = arith.constant 0 : i32
    return %1, %c0_i32 : i32, i32
  }
  func.func @transform_2(%arg0: i32, %arg1: i32) -> (i32, i32, i32) {
    %c0_i32 = arith.constant 0 : i32
    %c0_i32_0 = arith.constant 0 : i32
    %c0_i32_1 = arith.constant 0 : i32
    return %arg0, %c0_i32, %c0_i32_0 : i32, i32, i32
  }
  func.func @transform_3(%arg0: i32, %arg1: i32) -> (i32, i32, i32) {
    %c0_i32 = arith.constant 0 : i32
    %c0_i32_0 = arith.constant 0 : i32
    %c0_i32_1 = arith.constant 0 : i32
    return %arg0, %c0_i32, %c0_i32_0 : i32, i32, i32
  }
}

</mosaic_0001>

<bundles_post_ra>
// kernel: tpu_custom_call.1
= control target key start
LH: loop header
LB: loop body
LE: loop exit
PB: predicated region body
PF: predicated region fallthrough
CT: control target
= control target key end

     0   :  { %s988_s0 = inlined_call_operand.hbm [shape: f32[2,32,128], index: 0, kind: input, shape index: {}]   ;;  %s989_s1 = inlined_call_operand.hbm [shape: s32[32,128], index: 1, kind: input, shape index: {}]   ;;  %s990_s2 = inlined_call_operand.hbm [shape: f32[2,8,128], index: 2, kind: output, shape index: {0}]   ;;  %s991_s3 = inlined_call_operand.hbm [shape: f32[2,8,128], index: 3, kind: output, shape index: {1}]  }
   0x1   :  { %993 = sst [smem:[#allocation18_spill]] %s988_s0 }
   0x2   :  { %9 = vsyncpa [#allocation3], 0 }
   0x3   :  { %11 = vsyncpa [#allocation3 + $0x1], 0 }
   0x4   :  { %12 = vsyncpa [#allocation6], 0 }
   0x5   :  { %14 = vsyncpa [#allocation6 + $0x1], 0 }
   0x6   :  { %15 = vsyncpa [#allocation4], 0 }
   0x7   :  { %17 = vsyncpa [#allocation4 + $0x1], 0 }
   0x8   :  { %18 = vsyncpa [#allocation9], 0 }
   0x9   :  { %20 = vsyncpa [#allocation9 + $0x1], 0  ;;  %s809_s12 = smov 0   ;;  %s811_s13 = smov 0  }
   0xa   :  { %s813_s14 = smov 0   ;;  %s815_s15 = smov 0  }
   0xb   :  { %s817_s16 = smov 0   ;;  %s819_s17 = smov 0  }
   0xc LB: > { %s517_s18 = sadd.s32 4294967295, %s778_s17   ;;  %s518_s19 = sadd.s32 4294967294, %s778_s17   ;;  %s778_s17 = sphi %s819_s17, %s26_s17   ;;  %s774_s16 = sphi %s817_s16, %s1005_s16   ;;  %s770_s15 = sphi %s815_s15, %s1004_s15   ;;  %s766_s14 = sphi %s813_s14, %s1003_s14   ;;  %s762_s13 = sphi %s811_s13, %s1002_s13   ;;  %s758_s12 = sphi %s809_s12, %s1001_s12  }
   0xd   : > { %s38_s20 = sadd.s32 1, %s774_s16  ;;  %s47_s21 = sadd.s32 1, %s766_s14 }
   0xe   : > { %p40_p0 = scmp.ge.s32.totalorder %s38_s20, 2  ;;  %p54_p1 = scmp.ne.s32.totalorder %s766_s14, %s762_s13 }
   0xf   : > { %p55_p2 = scmp.eq.s32.totalorder %s778_s17, 0  ;;  %p60_p3 = scmp.ne.s32.totalorder %s762_s13, %s758_s12 }
  0x10   : > { %s1007_s20 = smov (%p40_p0, %s38_s20), 0  ;;  %p61_p5 = scmp.eq.s32.totalorder %s517_s18, 0 }
  0x11   : > { %994 = sst [smem:[#allocation17_spill]] %s1007_s20  ;;  %p850_p4 = por %p55_p2, %p54_p1 }
  0x12   : > { %s44_s23 = ssub.s32 %s774_s16, %s1007_s20  ;;  %p112_p6 = scmp.eq.s32.totalorder %s517_s18, 1 }
  0x13   : > { %p45_p7 = scmp.eq.s32.totalorder %s44_s23, 0  ;;  %p856_p8 = por %p61_p5, %p60_p3 }
  0x14   : > { %p860_p9 = por %p112_p6, %p54_p1  ;;  %p118_p10 = scmp.eq.s32.totalorder %s518_s19, 1 }
  0x15   : > { %s865_s26 = scalar_select %p45_p7, %s766_s14, %s47_s21  }
  0x16   : > { %p867_p11 = por %p118_p10, %p60_p3  ;;  %p520_p12 = scmp.ge.s32.totalorder %s778_s17, 2 }
  0x18   : > { %160 = sbr.rel (%p520_p12) target bundleno = 48 (0x30), region = 16 }
  0x1d   : > { %s875_s28 = sand.u32 1, %s766_s14   ;;  %s542_s29 = sshll.u32 %s774_s16, 4 }
  0x1e   : > { %s521_s30 = sshll.u32 %s875_s28, 5  ;;  %s999_s0 = sld [smem:[#allocation18_spill]] }
  0x1f   : > { %s544_s7 = scalar_select %p850_p4, [#allocation0], [#allocation12] }
  0x20   : > { %s168_s9 = scalar_lea.vmem [#allocation2], %s521_s30  ;;  %s780_s18 = smov 512  }
  0x21   : > { %s189_s10 = sshll.u32 %s168_s9, 4  ;;  %s179_s11 = sld [smem:[%s544_s7]]   ;;  %s190_s10 = int_to_ptr.vmem [resolvable:$true] %s189_s10 }
  0x22   : > { %545 = sst [smem:[#allocation11]] (%p850_p4), %s780_s18  ;;  %s781_s19 = smov 256  }
  0x23   : > { %546 = sst [smem:[#allocation11 + $0x1]] (%p850_p4), %s781_s19  ;;  %s782_s21 = smov 2  }
  0x24   : > { %s174_s6 = scalar_lea.hbm %s999_s0, %s542_s29  ;;  %547 = sst [smem:[#allocation11 + $0x2]] (%p850_p4), %s782_s21 }
  0x25   : > { %s187_s8 = sshll.u32 %s174_s6, 4  ;;  %s783_s23 = smov 128   ;;  %s188_s8 = int_to_ptr.hbm [resolvable:$true] %s187_s8 }
  0x26   : > { %548 = sst [smem:[#allocation11 + $0x3]] (%p850_p4), %s783_s23  ;;  %s784_s5 = smov 8  }
  0x27   : > { %s524_s30 = sshll.u32 %s179_s11, 26  ;;  %549 = sst [smem:[#allocation11 + $0x4]] (%p850_p4), %s783_s23 }
  0x28   : > { %s525_s4 = sadd.s32 134217728, %s524_s30  ;;  %550 = sst [smem:[#allocation11 + $0x5]] (%p850_p4), %s784_s5 }
  0x29   : > { %s165_s6 = scalar_lea.sflag [#allocation3], %s875_s28  ;;  %s785_s7 = smov [#allocation10]  }
  0x2a   : > { %551 = dma.general (%p850_p4), %s188_s8, 512, %s190_s10, %s165_s6, %s785_s7, [#allocation11], %s525_s4, 0  }
  0x2b   : > { %s526_s9 = sshll.u32 %s875_s28, 4  ;;  %s222_s11 = scalar_lea.hbm %s989_s1, %s542_s29 }
  0x2c   : > { %s223_s21 = sshll.u32 %s222_s11, 4  ;;  %s216_s23 = scalar_lea.vmem [#allocation5], %s526_s9  ;;  %s224_s21 = int_to_ptr.hbm [resolvable:$true] %s223_s21 }
  0x2d   : > { %s225_s30 = sshll.u32 %s216_s23, 4  ;;  %s213_s5 = scalar_lea.sflag [#allocation6], %s875_s28  ;;  %s226_s30 = int_to_ptr.vmem [resolvable:$true] %s225_s30 }
  0x2e   : > { %s786_s0 = smov 128   ;;  %s787_s20 = smov 8  }
  0x2f   : > { %552 = dma.hbm_to_vmem [thread:$0]  (%p850_p4), %s224_s21, 256, %s226_s30, %s213_s5, %s786_s0, %s786_s0, %s787_s20  }
  0x30 PF: > { %p529_p13 = scmp.ge.s32.totalorder %s778_s17, 1  ;;  %p233_p0 = scmp.lt.s32.totalorder %s778_s17, 3 }
  0x32   : > { %p234_p1 = pnand %p529_p13, %p233_p0 }
  0x33   : > { %s913_s29 = sand.u32 (!%p234_p1), 1, %s762_s13  }
  0x34   : > { %237 = sbr.rel (%p234_p1) target bundleno = 102 (0x66), region = 28  ;;  %s530_s8 = sshll.u32 (!%p234_p1), %s913_s29, 5 }
  0x35   : > { %s240_s10 = scalar_lea.sflag (!%p234_p1), [#allocation3], %s913_s29  ;;  %s243_s28 = scalar_lea.vmem (!%p234_p1), [#allocation2], %s530_s8 }
  0x39   : > { %741 = dma.done.wait (%p856_p8), %s240_s10, 512  }
  0x3a   : > { %743 = vsyncadd (%p856_p8), %s240_s10, 4294966784  ;;  %s531_s0 = sshll.u32 %s913_s29, 4  ;;  %s250_s20 = scalar_lea.sflag [#allocation6], %s913_s29 }
  0x3b   : > { %s253_s22 = scalar_lea.vmem [#allocation5], %s531_s0 }
  0x3c   : > { %745 = dma.done.wait (%p856_p8), %s250_s20, 256  }
  0x3d   : > { %747 = vsyncadd (%p856_p8), %s250_s20, 4294967040  ;;  %s532_s4 = sshll.u32 %s913_s29, 3  ;;  %s538_s6 = sshll.u32 %s770_s15, 3  ;;  %v297_v0 = vld [vmem:[%s243_s28] sm:$0xff]  ;;  %v298_v1 = vld [vmem:[%s243_s28 + $0x8] sm:$0xff]  ;;  %v788_v11 = vmov 0.0  }
  0x3e   : > { %v534_v2 = vld [vmem:[%s243_s28 + $0x10] sm:$0xff]  ;;  %v535_v3 = vld [vmem:[%s243_s28 + $0x18] sm:$0xff]  ;;  %s376_s9 = scalar_lea.hbm %s991_s3, %s538_s6  ;;  %s286_s18 = scalar_lea.vmem [#allocation8], %s532_s4 }
  0x3f   : > { %v302_v4 = vld [vmem:[%s253_s22] sm:$0xff]  ;;  %v303_v5 = vld [vmem:[%s253_s22 + $0x8] sm:$0xff]  ;;  %v308_v6 = vsub.f32 %v297_v0, %v534_v2  ;;  %v310_v7 = vsub.f32 %v534_v2, %v297_v0  ;;  %v309_v8 = vsub.f32 %v298_v1, %v535_v3  ;;  %v311_v9 = vsub.f32 %v535_v3, %v298_v1  ;;  %s378_s19 = sshll.u32 %s286_s18, 4  ;;  %s380_s11 = sshll.u32 %s376_s9, 4  ;;  %s379_s19 = int_to_ptr.vmem [resolvable:$true] %s378_s19  ;;  %s381_s11 = int_to_ptr.hbm [resolvable:$true] %s380_s11 }
  0x40   : > { %vm304_vm0 = vcmp.eq.s32.totalorder %v302_v4, 1  ;;  %vm305_vm1 = vcmp.eq.s32.totalorder %v303_v5, 1  ;;  %vm306_vm2 = vcmp.eq.s32.totalorder %v302_v4, 0  ;;  %vm307_vm3 = vcmp.eq.s32.totalorder %v303_v5, 0  ;;  %s352_s21 = scalar_lea.sflag [#allocation9], %s913_s29  ;;  %s674_s23 = sshra.s32 %s381_s11, 4  ;;  %s675_s23 = int_to_ptr.hbm [resolvable:$true] %s674_s23 }
  0x41   : > { %v312_v10 = vsel %vm304_vm0, %v308_v6, %v310_v7  ;;  %v332_v12 = vsel %vm306_vm2, 0.1, %v788_v11  ;;  %v333_v14 = vsel %vm307_vm3, 0.1, %v788_v11  ;;  %v313_v15 = vsel %vm305_vm1, %v309_v8, %v311_v9  ;;  %s676_s30 = scalar_lea.hbm %s675_s23, 8  ;;  %s680_s10 = scalar_lea.hbm %s991_s3, 16 }
  0x42   : > { %v316_v13 = vand.u32 2147483647, %v312_v10  ;;  %v334_v16 = vsel %vm304_vm0, 0.8, %v332_v12  ;;  %v335_v17 = vsel %vm305_vm1, 0.8, %v333_v14  ;;  %p677_p2 = scmp.ne.s32.totalorder %s675_s23, %s676_s30  ;;  %p681_p5 = scmp.lt.s32.totalorder %s675_s23, %s991_s3 }
  0x43   : > { %v317_v18 = vand.u32 2147483647, %v313_v15  ;;  %v343_v20 = vadd.f32 %v335_v17, %v334_v16  ;;  %p682_p6 = scmp.lt.s32.totalorder %s680_s10, %s676_s30 }
  0x44   : > { %v318_v19 = vsub.f32 0.0, %v316_v13  ;;  %p678_p3 = pnand %p677_p2, %p860_p9 }
  0x45   : > { %v319_v21 = vsub.f32 0.0, %v317_v18  ;;  %345 = vst [vmem:[%s286_s18] sm:$0xff] %v343_v20  ;;  %p683_p7 = por %p682_p6, %p681_p5 }
  0x46   : > { %v320_v22 = vmul.f32 1.442695, %v318_v19  ;;  %p679_p4 = pneg %p678_p3 }
  0x47   : > { %v322_v23 = vmul.f32 1.442695, %v319_v21 }
  0x48   : > { %624 = vpow2.f32 %v320_v22  ;;  %p684_p8 = pnand %p683_p7, %p679_p4 }
  0x4a   : > { %687 = shalt.err (!%p684_p8)
}
  0x4b   : > { %556 = dma.vmem_to_hbm [thread:$0]  (%p860_p9), %s379_s19, 128, %s381_s11, %s352_s21   ;;  %626 = vpow2.f32 %v322_v23  ;;  %v314_v28 = vmax.f32 %v312_v10, 0.0  ;;  %v315_v30 = vmax.f32 %v313_v15, 0.0 }
  0x4c   : > { %s362_s24 = scalar_lea.hbm %s990_s2, %s538_s6  ;;  %s279_s7 = scalar_lea.vmem [#allocation7], %s532_s4 }
  0x4d   : > { %s364_s9 = sshll.u32 %s279_s7, 4  ;;  %s366_s18 = sshll.u32 %s362_s24, 4  ;;  %s365_s9 = int_to_ptr.vmem [resolvable:$true] %s364_s9  ;;  %s367_s18 = int_to_ptr.hbm [resolvable:$true] %s366_s18 }
  0x4e   : > { %v625_v24 = vpop.eup %624  ;;  %s347_s19 = scalar_lea.sflag [#allocation4], %s913_s29  ;;  %s702_s11 = sshra.s32 %s367_s18, 4  ;;  %s703_s11 = int_to_ptr.hbm [resolvable:$true] %s702_s11 }
  0x4f   : > { %v324_v25 = vadd.f32 1.0, %v625_v24  ;;  %s704_s21 = scalar_lea.hbm %s703_s11, 8  ;;  %s708_s6 = scalar_lea.hbm %s990_s2, 16 }
  0x50   : > { %p705_p10 = scmp.ne.s32.totalorder %s703_s11, %s704_s21  ;;  %p709_p1 = scmp.lt.s32.totalorder %s703_s11, %s990_s2 }
  0x51   : > { %v627_v26 = vpop.eup %626  ;;  %628 = vlog2.f32 %v324_v25  ;;  %p710_p2 = scmp.lt.s32.totalorder %s708_s6, %s704_s21 }
  0x52   : > { %v325_v27 = vadd.f32 1.0, %v627_v26  ;;  %p706_p13 = pnand %p705_p10, %p860_p9 }
  0x53   : > { %p711_p3 = por %p710_p2, %p709_p1 }
  0x54   : > { %630 = vlog2.f32 %v325_v27  ;;  %p707_p0 = pneg %p706_p13 }
  0x56   : > { %p712_p4 = pnand %p711_p3, %p707_p0 }
  0x57   : > { %v629_v29 = vpop.eup %628 }
  0x58   : > { %v327_v31 = vmul.f32 0.6931472, %v629_v29 }
  0x5a   : > { %v631_v32 = vpop.eup %630  ;;  %v330_v34 = vadd.f32 %v327_v31, %v314_v28 }
  0x5b   : > { %v329_v33 = vmul.f32 0.6931472, %v631_v32 }
  0x5c   : > { %v336_v36 = vmul.f32 %v334_v16, %v330_v34 }
  0x5d   : > { %v331_v35 = vadd.f32 %v329_v33, %v315_v30 }
  0x5f   : > { %v337_v37 = vmul.f32 %v335_v17, %v331_v35 }
  0x61   : > { %v339_v38 = vadd.f32 %v337_v37, %v336_v36 }
  0x63   : > { %341 = vst [vmem:[%s279_s7] sm:$0xff] %v339_v38 }
  0x64   : > { %715 = shalt.err (!%p712_p4)
}
  0x65   : > { %555 = dma.vmem_to_hbm [thread:$0]  (%p860_p9), %s365_s9, 128, %s367_s18, %s347_s19  }
  0x66 PF: > { %s392_s29 = sand.u32 1, %s758_s12   ;;  %p560_p5 = pnand %p520_p12, %p867_p11 }
  0x67   : > { %s393_s5 = scalar_lea.sflag [#allocation4], %s392_s29 }
  0x68   : > { %p561_p6 = pneg %p560_p5 }
  0x6a   : > { %749 = dma.done.wait (%p561_p6), %s393_s5, 128  }
  0x6b   : > { %751 = vsyncadd (%p561_p6), %s393_s5, 4294967168  ;;  %s403_s8 = scalar_lea.sflag [#allocation9], %s392_s29 }
  0x6c   : > { %753 = dma.done.wait (%p561_p6), %s403_s8, 128  }
  0x6d   : > { %755 = vsyncadd (%p561_p6), %s403_s8, 4294967168  ;;  %s26_s17 = sadd.s32 1, %s778_s17   ;;  %s1000_s25 = sld [smem:[#allocation17_spill]] }
  0x6e   : > { %p23_p7 = scmp.ge.s32.totalorder %s26_s17, 4   ;;  %s1001_s12 = smov %s762_s13 }
  0x6f   : > { %s1002_s13 = smov %s766_s14  ;;  %s1003_s14 = smov %s865_s26 }
  0x70   : > { %s1004_s15 = smov %s774_s16  ;;  %25 = sbr.rel (!%p23_p7) target bundleno = 12 (0xc), region = 113 }
  0x73   : > { %s1005_s16 = smov %s1000_s25 }
  0x75   :  { %409 = vsyncpa [#allocation3], 1 }
  0x76   :  { %411 = vsyncpa [#allocation3 + $0x1], 1 }
  0x77   :  { %412 = vsyncpa [#allocation6], 1 }
  0x78   :  { %414 = vsyncpa [#allocation6 + $0x1], 1 }
  0x79   :  { %415 = vsyncpa [#allocation4], 1 }
  0x7a   :  { %417 = vsyncpa [#allocation4 + $0x1], 1 }
  0x7b   :  { %418 = vsyncpa [#allocation9], 1 }
  0x7c   :  { %420 = vsyncpa [#allocation9 + $0x1], 1 }

</bundles_post_ra>
